<compile_context>
chip_gen: v7x
topology: tpu7x:2x2x1
jax: 0.10.0
libtpu: 0.0.40
codegen_flags: <defaults>
</compile_context>

<pallas_src>
import jax
import jax.numpy as jnp
from jax.experimental import pallas as pl
from jax.experimental.pallas import tpu as pltpu


def _embeddings_kernel(patch_ref, w_ref, cls_ref, posb_ref, o_ref):
    """One grid step = Bt batch elements.

    patch_ref: (Bt*NP, PD)    flattened patches (compute dtype, e.g. bf16)
    w_ref:     (H, PD)        Conv2d weight flattened, NOT transposed
    cls_ref:   (1, H)         precomputed cls_token + pos_embed[0]      (f32)
    posb_ref:  (Bt*NP, H)     precomputed pos_embed[1:] + conv bias,
                              tiled Bt times                            (f32)
    o_ref:     (Bt, NP+1, H)  output embeddings
    """
    bt, seq, hidden = o_ref.shape
    npatch = seq - 1

    # (Bt*NP, PD) x (H, PD)^T -> (Bt*NP, H); f32 accumulation on the MXU.
    proj = jax.lax.dot_general(
        patch_ref[...], w_ref[...],
        dimension_numbers=(((1,), (1,)), ((), ())),
        preferred_element_type=jnp.float32)
    body = proj + posb_ref[...]                          # (Bt*NP, H) f32

    # Direct slab writes — no concatenate, no full-tile relayout.
    o_ref[:, 0:1, :] = jnp.broadcast_to(
        cls_ref[...][None, :, :], (bt, 1, hidden)).astype(o_ref.dtype)
    o_ref[:, 1:, :] = body.reshape(bt, npatch, hidden).astype(o_ref.dtype)


def _vmem_capacity_bytes(default=64 * 1024 * 1024):
    """Per-core VMEM capacity; conservative 64 MiB (v7x) fallback."""
    try:
        info = pltpu.get_tpu_info()
        cap = getattr(info, "vmem_capacity_bytes", None)
        if cap:
            return int(cap)
    except Exception:
        pass
    return default


def _pick_batch_tile(batch, num_patches, est_fn, budget, target_rows=1024):
    """Largest batch tile (divisor of B) whose block is sublane-legal
    ((Bt*NP) % 8 == 0 or full), fills the MXU M dim and fits the VMEM budget.

    Grid steps are a serial loop on single-TC chips (v5e/v6e), so we do NOT
    force multiple steps; on dual-TC parts Pallas shards whatever steps exist.
    """
    divisors = [d for d in range(1, batch + 1) if batch % d == 0]
    legal = [d for d in divisors
             if (d * num_patches) % 8 == 0 or d == batch]
    good = [d for d in legal
            if d * num_patches <= target_rows and est_fn(d) <= budget]
    if good:
        return max(good)
    fits = [d for d in legal if est_fn(d) <= budget]
    if fits:
        return min(fits)
    return min(legal)


def vit_embeddings(x_nchw, w_conv, b_conv, cls_token, pos_embed, patch_size,
                   compute_dtype=jnp.bfloat16, out_dtype=None,
                   target_rows=1024):
    """Forward pass of Embeddings (1d_learned positional embedding, eval mode).

    x_nchw:    (B, C, H, W)        image batch (PyTorch NCHW convention)
    w_conv:    (hidden, C, P, P)   Conv2d weight
    b_conv:    (hidden,)           Conv2d bias
    cls_token: (1, 1, hidden)
    pos_embed: (1, NP+1, hidden)
    returns:   (B, NP+1, hidden)   in out_dtype (default: x_nchw.dtype)

    Note: compute_dtype=bf16 casts patches/weight for the MXU (covered by the
    loose tolerance in the tests); pass jnp.float32 for exact-ish numerics.
    """
    B, C, H, W = x_nchw.shape
    P = patch_size
    G = H // P
    NP = G * G
    hidden = w_conv.shape[0]
    PD = C * P * P
    out_dtype = jnp.dtype(x_nchw.dtype) if out_dtype is None else jnp.dtype(out_dtype)

    # --- glue: patchify in compute dtype.  With allow_input_fusion below, XLA
    # may fuse this producer chain into the pallas_call's input read so no
    # (B*NP, PD) copy is materialized in HBM.
    xc = x_nchw.astype(compute_dtype)
    xp = xc.reshape(B, C, G, P, G, P)
    xp = jnp.transpose(xp, (0, 2, 4, 1, 3, 5))           # (B, Gh, Gw, C, P, P)
    patches2d = xp.reshape(B * NP, PD)                   # (B*NP, PD)

    # Conv2d(kernel=P, stride=P) == linear over the flattened (c, ph, pw)
    # patch.  Keep the weight as (hidden, PD) — no per-call HBM transpose.
    w_proj = w_conv.reshape(hidden, PD).astype(compute_dtype)

    # Batch-invariant work hoisted out of the kernel (f32).
    pos = pos_embed.reshape(NP + 1, hidden).astype(jnp.float32)
    cls_row = cls_token.reshape(1, hidden).astype(jnp.float32) + pos[0:1, :]
    pos_body = pos[1:, :] + b_conv.astype(jnp.float32)[None, :]   # (NP, H)

    # --- generation-aware tile selection & VMEM budget.
    vmem_cap = _vmem_capacity_bytes()
    budget = (vmem_cap * 3) // 4                 # leave headroom under the cap
    bpe_in = jnp.dtype(compute_dtype).itemsize
    bpe_out = out_dtype.itemsize

    def est(bt):
        rows = bt * NP
        return (2 * rows * PD * bpe_in                   # patches stream (x2 buf)
                + 2 * bt * (NP + 1) * hidden * bpe_out   # output stream (x2 buf)
                + 2 * hidden * PD * bpe_in               # weight (resident)
                + 2 * rows * hidden * 4                  # pos body tile (resident)
                + 2 * hidden * 4                         # cls row
                + 2 * rows * hidden * 4)                 # f32 matmul result / body

    Bt = _pick_batch_tile(B, NP, est, budget, target_rows=target_rows)
    grid = (B // Bt,)

    # Batch-invariant positional body pre-tiled to the batch tile (fetched
    # once thanks to the constant index_map).
    posb_tiled = jnp.tile(pos_body, (Bt, 1))             # (Bt*NP, H)

    vmem_limit = int(max(8 * 1024 * 1024, min(budget, 2 * est(Bt))))

    grid_spec = pltpu.PrefetchScalarGridSpec(
        num_scalar_prefetch=0,
        grid=grid,
        in_specs=[
            pl.BlockSpec((Bt * NP, PD), lambda b: (b, 0)),       # patches
            pl.BlockSpec((hidden, PD), lambda b: (0, 0)),        # weight
            pl.BlockSpec((1, hidden), lambda b: (0, 0)),         # cls + pos0
            pl.BlockSpec((Bt * NP, hidden), lambda b: (0, 0)),   # pos body + bias
        ],
        out_specs=pl.BlockSpec((Bt, NP + 1, hidden), lambda b: (b, 0, 0)),
    )

    return pl.pallas_call(
        _embeddings_kernel,
        out_shape=jax.ShapeDtypeStruct((B, NP + 1, hidden), out_dtype),
        grid_spec=grid_spec,
        compiler_params=pltpu.CompilerParams(
            dimension_semantics=("parallel",),
            allow_input_fusion=[True, False, False, False],
            vmem_limit_bytes=vmem_limit),
    )(patches2d, w_proj, cls_row, posb_tiled)


def reference_embeddings(x_nchw, w_conv, b_conv, cls_token, pos_embed, patch_size):
    """Pure-JAX reference (mirrors the PyTorch forward, eval mode, f32)."""
    proj = jax.lax.conv_general_dilated(
        x_nchw, w_conv,
        window_strides=(patch_size, patch_size),
        padding="VALID",
        dimension_numbers=("NCHW", "OIHW", "NCHW"),
    ) + b_conv[None, :, None, None]
    B, Hc, gh, gw = proj.shape
    tokens = proj.reshape(B, Hc, gh * gw).transpose(0, 2, 1)    # (B, NP, hidden)
    cls = jnp.broadcast_to(cls_token, (B, 1, Hc))
    x = jnp.concatenate([cls, tokens], axis=1)
    return x + pos_embed


if __name__ == "__main__":
    # config: image_size=16, patch_size=4, num_channels=4, hidden_size=32,
    #         positional_embedding='1d_learned', dropout -> eval identity
    image_size, patch_size, num_channels, hidden_size = 16, 4, 4, 32
    num_patches = (image_size // patch_size) ** 2
    initializer_range = 0.02

    key = jax.random.PRNGKey(0)
    kx, kw, kb, kc, kp, kx2 = jax.random.split(key, 6)

    x = jax.random.normal(kx, (2, num_channels, image_size, image_size),
                          dtype=jnp.float32)
    # deterministic synthetic params (trunc_normal(std=0.02) approximated by
    # normal * 0.02 — same scale, synthetic weights)
    w_conv = jax.random.normal(
        kw, (hidden_size, num_channels, patch_size, patch_size),
        dtype=jnp.float32) * initializer_range
    b_conv = jax.random.normal(kb, (hidden_size,), dtype=jnp.float32) * 0.01
    cls_token = jax.random.normal(kc, (1, 1, hidden_size),
                                  dtype=jnp.float32) * initializer_range
    pos_embed = jax.random.normal(kp, (1, num_patches + 1, hidden_size),
                                  dtype=jnp.float32) * initializer_range

    ref = reference_embeddings(x, w_conv, b_conv, cls_token, pos_embed,
                               patch_size)

    # 1) f32 compute path — tight numerics check.
    out_f32 = vit_embeddings(x, w_conv, b_conv, cls_token, pos_embed,
                             patch_size, compute_dtype=jnp.float32)
    out_f32 = jax.block_until_ready(out_f32)
    assert out_f32.shape == (2, num_patches + 1, hidden_size), out_f32.shape
    assert jnp.allclose(out_f32, ref, atol=1e-5, rtol=1e-5), \
        float(jnp.max(jnp.abs(out_f32 - ref)))

    # 2) bf16 matmul-input path (default) — loose tolerance vs f32 reference.
    out_bf16 = vit_embeddings(x, w_conv, b_conv, cls_token, pos_embed,
                              patch_size)
    out_bf16 = jax.block_until_ready(out_bf16)
    assert out_bf16.shape == (2, num_patches + 1, hidden_size)
    assert jnp.allclose(out_bf16, ref, atol=2e-2, rtol=2e-2), \
        float(jnp.max(jnp.abs(out_bf16 - ref)))

    # 3) larger batch with a forced small row target -> Bt < B, multi-step
    #    grid (exercises the streamed/resident operand split).
    x8 = jax.random.normal(kx2, (8, num_channels, image_size, image_size),
                           dtype=jnp.float32)
    ref8 = reference_embeddings(x8, w_conv, b_conv, cls_token, pos_embed,
                                patch_size)
    out8 = vit_embeddings(x8, w_conv, b_conv, cls_token, pos_embed, patch_size,
                          target_rows=32)
    out8 = jax.block_until_ready(out8)
    assert out8.shape == (8, num_patches + 1, hidden_size)
    assert jnp.allclose(out8, ref8, atol=2e-2, rtol=2e-2), \
        float(jnp.max(jnp.abs(out8 - ref8)))

    # 4) bf16 output path (halves output HBM traffic for bf16 encoders).
    out_bf16o = vit_embeddings(x, w_conv, b_conv, cls_token, pos_embed,
                               patch_size, out_dtype=jnp.bfloat16)
    out_bf16o = jax.block_until_ready(out_bf16o)
    assert out_bf16o.dtype == jnp.bfloat16
    assert jnp.allclose(out_bf16o.astype(jnp.float32), ref,
                        atol=3e-2, rtol=3e-2), \
        float(jnp.max(jnp.abs(out_bf16o.astype(jnp.float32) - ref)))

    print("KERNEL_OK")
</pallas_src>

<mosaic_0001>
module attributes {stable_mosaic.version = 11 : i64} {
  func.func @_embeddings_kernel(%arg0: i32, %arg1: memref<32x64xf32, #tpu.memory_space<vmem>>, %arg2: memref<32x64xf32, #tpu.memory_space<vmem>>, %arg3: memref<1x32xf32, #tpu.memory_space<vmem>>, %arg4: memref<32x32xf32, #tpu.memory_space<vmem>>, %arg5: memref<2x17x32xf32, #tpu.memory_space<vmem>>) attributes {dimension_semantics = [#tpu.dimension_semantics<parallel>], iteration_bounds = array<i64: 1>, scalar_prefetch = 0 : i64, scratch_operands = 0 : i64, tpu.core_type = #tpu.core_type<tc>, window_params = [{transform_indices = @transform_0, window_bounds = array<i64: 32, 64>}, {pipeline_mode = #tpu.pipeline_mode<synchronous>, transform_indices = @transform_1, window_bounds = array<i64: 32, 64>}, {pipeline_mode = #tpu.pipeline_mode<synchronous>, transform_indices = @transform_2, window_bounds = array<i64: 1, 32>}, {pipeline_mode = #tpu.pipeline_mode<synchronous>, transform_indices = @transform_3, window_bounds = array<i64: 32, 32>}, {transform_indices = @transform_4, window_bounds = array<i64: 2, 17, 32>}]} {
    %c0 = arith.constant 0 : index
    %c0_0 = arith.constant 0 : index
    %0 = vector.load %arg1[%c0, %c0_0] : memref<32x64xf32, #tpu.memory_space<vmem>>, vector<32x64xf32>
    %c0_1 = arith.constant 0 : index
    %c0_2 = arith.constant 0 : index
    %1 = vector.load %arg2[%c0_1, %c0_2] : memref<32x64xf32, #tpu.memory_space<vmem>>, vector<32x64xf32>
    %cst = arith.constant dense<0.000000e+00> : vector<32x32xf32>
    %2 = tpu.matmul %0, %1, %cst {dimension_numbers = #tpu.dot_dimension_numbers<[1], [1], [0], [0], [0, 0, 1, 0], [], []>} : vector<32x64xf32>, vector<32x64xf32>, vector<32x32xf32> -> vector<32x32xf32>
    %c0_3 = arith.constant 0 : index
    %c0_4 = arith.constant 0 : index
    %3 = vector.load %arg4[%c0_3, %c0_4] : memref<32x32xf32, #tpu.memory_space<vmem>>, vector<32x32xf32>
    %4 = arith.addf %2, %3 : vector<32x32xf32>
    %c0_5 = arith.constant 0 : index
    %c0_6 = arith.constant 0 : index
    %5 = vector.load %arg3[%c0_5, %c0_6] : memref<1x32xf32, #tpu.memory_space<vmem>>, vector<1x32xf32>
    %6 = vector.shape_cast %5 : vector<1x32xf32> to vector<1x1x32xf32>
    %7 = vector.shape_cast %6 : vector<1x1x32xf32> to vector<1x1x32xf32>
    %8 = vector.broadcast %7 : vector<1x1x32xf32> to vector<2x1x32xf32>
    %c0_7 = arith.constant 0 : index
    %c0_8 = arith.constant 0 : index
    %c0_9 = arith.constant 0 : index
    %9 = vector.load %arg5[%c0_7, %c0_8, %c0_9] : memref<2x17x32xf32, #tpu.memory_space<vmem>>, vector<2x1x32xf32>
    tpu.vector_store %arg5[%c0_7, %c0_8, %c0_9], %8 {strides = array<i32>} : memref<2x17x32xf32, #tpu.memory_space<vmem>>, vector<2x1x32xf32>,
    %10 = vector.shape_cast %4 : vector<32x32xf32> to vector<2x16x32xf32>
    %c0_10 = arith.constant 0 : index
    %c1 = arith.constant 1 : index
    %c0_11 = arith.constant 0 : index
    %11 = vector.load %arg5[%c0_10, %c1, %c0_11] : memref<2x17x32xf32, #tpu.memory_space<vmem>>, vector<2x16x32xf32>
    tpu.vector_store %arg5[%c0_10, %c1, %c0_11], %10 {strides = array<i32>} : memref<2x17x32xf32, #tpu.memory_space<vmem>>, vector<2x16x32xf32>,
    return
  }
  func.func @transform_0(%arg0: i32) -> (i32, i32) {
    %c0_i32 = arith.constant 0 : i32
    %c0_i32_0 = arith.constant 0 : i32
    return %arg0, %c0_i32 : i32, i32
  }
  func.func @transform_1(%arg0: i32) -> (i32, i32) {
    %c0_i32 = arith.constant 0 : i32
    %c0_i32_0 = arith.constant 0 : i32
    %c0_i32_1 = arith.constant 0 : i32
    return %c0_i32, %c0_i32_0 : i32, i32
  }
  func.func @transform_2(%arg0: i32) -> (i32, i32) {
    %c0_i32 = arith.constant 0 : i32
    %c0_i32_0 = arith.constant 0 : i32
    %c0_i32_1 = arith.constant 0 : i32
    return %c0_i32, %c0_i32_0 : i32, i32
  }
  func.func @transform_3(%arg0: i32) -> (i32, i32) {
    %c0_i32 = arith.constant 0 : i32
    %c0_i32_0 = arith.constant 0 : i32
    %c0_i32_1 = arith.constant 0 : i32
    return %c0_i32, %c0_i32_0 : i32, i32
  }
  func.func @transform_4(%arg0: i32) -> (i32, i32, i32) {
    %c0_i32 = arith.constant 0 : i32
    %c0_i32_0 = arith.constant 0 : i32
    %c0_i32_1 = arith.constant 0 : i32
    return %arg0, %c0_i32, %c0_i32_0 : i32, i32, i32
  }
}

</mosaic_0001>

<bundles_post_ra>
// kernel: tpu_custom_call.1
= control target key start
LH: loop header
LB: loop body
LE: loop exit
PB: predicated region body
PF: predicated region fallthrough
CT: control target
= control target key end

     0   :  { %9 = vsyncpa [#allocation3], 0  ;;  %s445_s0 = inlined_call_operand.hbm [shape: f32[32,64], index: 0, kind: input, shape index: {}]   ;;  %s446_s1 = inlined_call_operand.hbm [shape: f32[32,64], index: 1, kind: input, shape index: {}]   ;;  %s447_s2 = inlined_call_operand.vmem [shape: f32[1,32], index: 2, kind: input, shape index: {}]   ;;  %s448_s3 = inlined_call_operand.hbm [shape: f32[32,32], index: 3, kind: input, shape index: {}]   ;;  %s449_s4 = inlined_call_operand.vmem [shape: f32[2,17,32], index: 4, kind: output, shape index: {}]  }
   0x1   :  { %10 = vsyncpa [#allocation5], 0  ;;  %s316_s15 = smov [#allocation4]   ;;  %s317_s17 = smov [#allocation2]  }
   0x2   :  { %s28_s16 = sshll.u32 %s316_s15, 4  ;;  %s16_s18 = sshll.u32 %s317_s17, 4  ;;  %s29_s16 = int_to_ptr.vmem [resolvable:$true] %s28_s16  ;;  %s346_s18 = int_to_ptr.vmem [resolvable:$true] %s16_s18 }
   0x3   :  { %s246_s21 = scalar_lea.hbm %s446_s1, 512 }
   0x4   :  { %p247_p0 = scmp.ne.s32.totalorder %s446_s1, %s246_s21  ;;  %p250_p1 = scmp.lt.u32.totalorder %s246_s21, %s446_s1 }
   0x6   :  { %p252_p2 = pnand %p250_p1, %p247_p0 }
   0x8   :  { %255 = shalt.err (!%p252_p2)
}
   0x9   :  { %s256_s26 = scalar_lea.vmem %s29_s16, 512  ;;  %p261_p4 = scmp.lt.s32.totalorder %s29_s16, %s29_s16 }
   0xa   :  { %p257_p3 = scmp.ne.s32.totalorder %s29_s16, %s256_s26  ;;  %p262_p5 = scmp.lt.s32.totalorder %s256_s26, %s256_s26 }
   0xc   :  { %p263_p6 = por %p262_p5, %p261_p4 }
   0xe   :  { %p264_p7 = pnand %p263_p6, %p257_p3 }
  0x10   :  { %267 = shalt.err (!%p264_p7)
}
  0x11   :  { %s318_s27 = smov 128   ;;  %s319_s28 = smov 8  }
  0x12   :  { %34 = dma.hbm_to_vmem [thread:$0]  %s446_s1, 512, %s29_s16, [#allocation5], %s318_s27, %s318_s27, %s319_s28  }
  0x13   :  { %s268_s7 = scalar_lea.hbm %s445_s0, 512 }
  0x14   :  { %p269_p8 = scmp.ne.s32.totalorder %s445_s0, %s268_s7  ;;  %p272_p9 = scmp.lt.u32.totalorder %s268_s7, %s445_s0 }
  0x16   :  { %p274_p10 = pnand %p272_p9, %p269_p8 }
  0x18   :  { %277 = shalt.err (!%p274_p10)
}
  0x19   :  { %s278_s12 = scalar_lea.vmem %s346_s18, 512  ;;  %p283_p12 = scmp.lt.s32.totalorder %s346_s18, %s346_s18 }
  0x1a   :  { %p279_p11 = scmp.ne.s32.totalorder %s346_s18, %s278_s12  ;;  %p284_p13 = scmp.lt.s32.totalorder %s278_s12, %s278_s12 }
  0x1c   :  { %p285_p0 = por %p284_p13, %p283_p12 }
  0x1e   :  { %p286_p1 = pnand %p285_p0, %p279_p11 }
  0x20   :  { %289 = shalt.err (!%p286_p1)
}
  0x21   :  { %22 = dma.hbm_to_vmem [thread:$0]  %s445_s0, 512, %s346_s18, [#allocation3], %s318_s27, %s318_s27, %s319_s28  }
  0x22   :  { %s320_s14 = smov [#allocation6]   ;;  %s290_s19 = scalar_lea.hbm %s448_s3, 512 }
  0x23   :  { %s42_s15 = sshll.u32 %s320_s14, 4  ;;  %p291_p2 = scmp.ne.s32.totalorder %s448_s3, %s290_s19  ;;  %s43_s15 = int_to_ptr.vmem [resolvable:$true] %s42_s15 }
  0x24   :  { %p294_p3 = scmp.lt.u32.totalorder %s290_s19, %s448_s3 }
  0x26   :  { %p296_p4 = pnand %p294_p3, %p291_p2 }
  0x28   :  { %299 = shalt.err (!%p296_p4)
}
  0x29   :  { %s300_s24 = scalar_lea.vmem %s43_s15, 512  ;;  %p305_p6 = scmp.lt.s32.totalorder %s43_s15, %s43_s15 }
  0x2a   :  { %p301_p5 = scmp.ne.s32.totalorder %s43_s15, %s300_s24  ;;  %p306_p7 = scmp.lt.s32.totalorder %s300_s24, %s300_s24 }
  0x2c   :  { %p307_p8 = por %p306_p7, %p305_p6 }
  0x2e   :  { %p308_p9 = pnand %p307_p8, %p301_p5 }
  0x30   :  { %311 = shalt.err (!%p308_p9)
}
  0x31   :  { %48 = dma.hbm_to_vmem [thread:$0]  %s448_s3, 512, %s43_s15, [#allocation5], %s318_s27, %s318_s27, %s319_s28  }
  0x32   :  { %312 = dma.done.wait [#allocation3], 512  }
  0x33   :  { %313 = vsyncadd [#allocation3], 4294966784 }
  0x34   :  { %314 = dma.done.wait [#allocation5], 1024  }
  0x35   :  { %315 = vsyncadd [#allocation5], 4294966272  ;;  %vm70_vm0 = vcmask 523264   ;;  %vm181_vm1 = vcmask 253952   ;;  %v180_v1 = vld [vmem:[%s447_s2] sm:$0x1] }
  0x36   :  { %vm400_vm2 = vmpackc.low %vm70_vm0, %vm70_vm0  ;;  %v62_v2 = vld [vmem:[#allocation4] sm:$0xff]  ;;  %v63_v3 = vld [vmem:[#allocation4 + $0x8] sm:$0xff]  ;;  %182 = vst.msk [vmem:[%s449_s4] sm:$0x1] %vm181_vm1, %v180_v1  ;;  %vm184_vm3 = vcmask 261120  }
  0x37   :  { %183 = vst.msk [vmem:[%s449_s4 + $0x18] sm:$0x1] %vm181_vm1, %v180_v1  ;;  %v225_v4 = vpack.c.bf16 %v63_v3, %v62_v2  ;;  %v64_v5 = vld [vmem:[#allocation4 + $0x10] sm:$0xff]  ;;  %v65_v6 = vld [vmem:[#allocation4 + $0x18] sm:$0xff]  ;;  %v58_v7 = vld [vmem:[#allocation2] sm:$0xff] }
  0x38   :  { %v231_v8 = vpack.c.bf16 %v65_v6, %v64_v5  ;;  %219 = vmatprep.mubr.msk.f32.mxu0 %vm70_vm0, %v58_v7  ;;  %v60_v9 = vld [vmem:[#allocation2 + $0x10] sm:$0xff]  ;;  %v59_v10 = vld [vmem:[#allocation2 + $0x8] sm:$0xff]  ;;  %v61_v11 = vld [vmem:[#allocation2 + $0x18] sm:$0xff] }
  0x39   :  { %227 = vmatprep.subr.msk.bf16.mxu0 %vm400_vm2, %v225_v4  ;;  %237 = vmatprep.subr.msk.bf16.mxu1 %vm400_vm2, %v225_v4  ;;  %v67_v12 = vld [vmem:[#allocation6 + $0x8] sm:$0xff]  ;;  %v69_v13 = vld [vmem:[#allocation6 + $0x18] sm:$0xff]  ;;  %v66_v14 = vld [vmem:[#allocation6] sm:$0xff] }
  0x3a   :  { %230 = vmatpush3.bf16.xpose.msk.msra.mxu0 %vm400_vm2, %v225_v4  ;;  %239 = vmatpush3.bf16.xpose.msk.msra.mxu1 %vm400_vm2, %v225_v4  ;;  %v68_v15 = vld [vmem:[#allocation6 + $0x10] sm:$0xff] }
  0x3b   :  { %233 = vmatprep.subr.msk.bf16.mxu0 %vm400_vm2, %v231_v8  ;;  %238 = vmatprep.subr.msk.bf16.mxu1 %vm400_vm2, %v231_v8 }
  0x3c   :  { %222 = vmatprep.mubr.msk.f32.mxu1 %vm70_vm0, %v60_v9 }
  0x42   :  { %236 = vmatpush3.bf16.xpose.msk.msra.mxu0 %vm400_vm2, %v231_v8  ;;  %240 = vmatpush3.bf16.xpose.msk.msra.mxu1 %vm400_vm2, %v231_v8 }
  0x49   :  { %220 = vmatmul.mubr.msk.f32.vlgmr.msra.gmra.mrb[0].mxu0 %vm70_vm0, %v59_v10  ;;  %223 = vmatmul.mubr.msk.f32.vlgmr.msra.gmra.mrb[0].mxu1 %vm70_vm0, %v61_v11 }
 0x11c   :  { %v221_v16 = vpop.f32.mrb[0].mxu0  ;;  %v224_v17 = vpop.f32.mrb[0].mxu1 }
 0x11d   :  { %v167_v18 = vadd.f32 %v221_v16, %v67_v12  ;;  %v177_v19 = vadd.f32 %v224_v17, %v69_v13  ;;  %v161_v20 = vpop.f32.mrb[1].mxu0  ;;  %v171_v21 = vpop.f32.mrb[1].mxu1 }
 0x11e   :  { %v162_v22 = vadd.f32 %v161_v20, %v66_v14  ;;  %v172_v23 = vadd.f32 %v171_v21, %v68_v15 }
 0x11f   :  { %186 = vst.msk [vmem:[%s449_s4 + $0x9] sm:$0xff] %vm184_vm3, %v167_v18  ;;  %188 = vst.msk [vmem:[%s449_s4 + $0x21] sm:$0xff] %vm184_vm3, %v177_v19 }
 0x120   :  { %185 = vst.msk [vmem:[%s449_s4 + $0x1] sm:$0xff] %vm184_vm3, %v162_v22  ;;  %187 = vst.msk [vmem:[%s449_s4 + $0x19] sm:$0xff] %vm184_vm3, %v172_v23 }
 0x121   :  { %193 = vsyncpa [#allocation3], 1 }
 0x122   :  { %194 = vsyncpa [#allocation5], 1 }

</bundles_post_ra>
